<compile_context>
chip_gen: v5e
topology: v5e:2x2
jax: 0.10.0
libtpu: 0.0.40
codegen_flags: <defaults>
</compile_context>

<pallas_src>
import jax
import jax.numpy as jnp
from jax.experimental import pallas as pl
from jax.experimental.pallas import tpu as pltpu

LANE = 128


# ----------------------------- Pallas kernel -----------------------------
def lmf_kernel(x_ref, wa_ref, wb_ref, bf_ref, w2_ref, b2_ref,
               wr1_ref, br1_ref, wr2_ref, br2_ref, wr3_ref, br3_ref,
               out_ref):
    TB, N, D = x_ref.shape
    H = wa_ref.shape[1]

    x3 = x_ref[...]                                            # (TB, N, D) f32
    # cyclic successor along the element axis: xs[:, i, :] = x[:, (i+1) % N, :]
    xs3 = jnp.concatenate([x3[:, 1:, :], x3[:, :1, :]], axis=1)

    x2 = x3.reshape(TB * N, D)
    xs2 = xs3.reshape(TB * N, D)

    # fused (embedding o first chiral-MLP layer): two K=D matmuls summed into
    # the same f32 accumulator -- no 2H lane concat, no separate embedding.
    # (bf16-cast of the dot inputs is a v6e/v7x option; kept f32 for exactness)
    h = (jnp.dot(x2, wa_ref[...], preferred_element_type=jnp.float32)
         + jnp.dot(xs2, wb_ref[...], preferred_element_type=jnp.float32)
         + bf_ref[...])
    h = jnp.maximum(h, 0.0)
    z = jnp.dot(h, w2_ref[...], preferred_element_type=jnp.float32) + b2_ref[...]

    # aggregate over the elements of the set -> (TB, H)
    pooled = jnp.sum(z.reshape(TB, N, H), axis=1)

    # reduction MLP, lane-padded to 128 columns everywhere (exact padding)
    r = jnp.maximum(
        jnp.dot(pooled, wr1_ref[...], preferred_element_type=jnp.float32)
        + br1_ref[...], 0.0)
    r = jnp.maximum(
        jnp.dot(r, wr2_ref[...], preferred_element_type=jnp.float32)
        + br2_ref[...], 0.0)
    out = jnp.dot(r, wr3_ref[...], preferred_element_type=jnp.float32) + br3_ref[...]

    out_ref[...] = out.astype(out_ref.dtype)                   # (TB, 128) lane-dense


# ----------------------------- wrapper ------------------------------------
def _pick_tb(B, N, target_rows=512):
    """Set-block size: fill the MXU M dimension, keep (TB,128) out block aligned."""
    if B * N <= target_rows:
        return B
    cap = max(1, target_rows // max(N, 1))
    for cand in range(min(cap, B), 0, -1):           # prefer multiple-of-8 divisors
        if B % cand == 0 and cand % 8 == 0:
            return cand
    for cand in range(min(cap, B), 0, -1):
        if B % cand == 0:
            return cand
    return B


def layer_management_framework(x, params):
    B, N, D = x.shape
    H = params["we"].shape[1]
    out_dim = params["wr3"].shape[1]

    # ---- one-time algebraic weight fusion (plain XLA ops, outside kernel) ----
    w1a, w1b = params["w1"][:H], params["w1"][H:]
    wa = params["we"] @ w1a                                    # (D, H)
    wb = params["we"] @ w1b                                    # (D, H)
    bf = params["be"] @ (w1a + w1b) + params["b1"]             # (1, H)

    # ---- zero-pad the reduction tail to 128 lanes (exact) ----
    pad_c = lambda w, c: jnp.pad(w, ((0, 0), (0, c - w.shape[1])))
    pad_r = lambda w, r: jnp.pad(w, ((0, r - w.shape[0]), (0, 0)))
    wr1p = pad_c(params["wr1"], LANE)                          # (H, 128)
    br1p = pad_c(params["br1"], LANE)
    wr2p = pad_c(pad_r(params["wr2"], LANE), LANE)             # (128, 128)
    br2p = pad_c(params["br2"], LANE)
    wr3p = pad_c(pad_r(params["wr3"], LANE), LANE)             # (128, 128)
    br3p = pad_c(params["br3"], LANE)

    weights = (wa, wb, bf, params["w2"], params["b2"],
               wr1p, br1p, wr2p, br2p, wr3p, br3p)

    TB = _pick_tb(B, N)
    grid = (B // TB,)

    def resident(a):  # full-array block, same block every grid step -> stays in VMEM
        return pl.BlockSpec(a.shape, lambda i: (0,) * a.ndim)

    out_padded = pl.pallas_call(
        lmf_kernel,
        out_shape=jax.ShapeDtypeStruct((B, LANE), jnp.float32),
        grid=grid,
        in_specs=[pl.BlockSpec((TB, N, D), lambda i: (i, 0, 0))]
                 + [resident(w) for w in weights],
        out_specs=pl.BlockSpec((TB, LANE), lambda i: (i, 0)),
        compiler_params=pltpu.CompilerParams(
            dimension_semantics=("parallel",)),
    )(x, *weights)

    return out_padded[:, :out_dim]


# ------------------------- pure-JAX reference (unfused) --------------------
def reference(x, p):
    B, N, D = x.shape
    H = p["we"].shape[1]
    e = (x.reshape(B * N, D) @ p["we"] + p["be"]).reshape(B, N, H)
    rolled = jnp.concatenate([e[:, 1:, :], e[:, :1, :]], axis=1)
    cat = jnp.concatenate([e, rolled], axis=-1).reshape(B * N, 2 * H)
    h = jax.nn.relu(cat @ p["w1"] + p["b1"])
    z = (h @ p["w2"] + p["b2"]).reshape(B, N, H)
    pooled = z.sum(axis=1)
    r = jax.nn.relu(pooled @ p["wr1"] + p["br1"])
    r = jax.nn.relu(r @ p["wr2"] + p["br2"])
    return r @ p["wr3"] + p["br3"]


# --------------------------- parameter setup ------------------------------
def init_params(key, in_dim, hidden_dim, out_dim):
    H = hidden_dim
    ks = jax.random.split(key, 13)
    g = lambda k, shape, fan_in: (jax.random.normal(k, shape, jnp.float32)
                                  / jnp.sqrt(jnp.float32(fan_in)))
    return {
        # embedding Linear(in_dim, H) -- stored as (in, out)
        "we": g(ks[0], (in_dim, H), in_dim), "be": g(ks[1], (1, H), 1),
        # chiral S-node MLPs: Linear(2H, H), Linear(H, H)
        "w1": g(ks[2], (2 * H, H), 2 * H), "b1": g(ks[3], (1, H), 1),
        "w2": g(ks[4], (H, H), H),         "b2": g(ks[5], (1, H), 1),
        # reduction layers: H -> H/2 -> H/4 -> out_dim
        "wr1": g(ks[6], (H, H // 2), H),           "br1": g(ks[7], (1, H // 2), 1),
        "wr2": g(ks[8], (H // 2, H // 4), H // 2), "br2": g(ks[9], (1, H // 4), 1),
        "wr3": g(ks[10], (H // 4, out_dim), H // 4), "br3": g(ks[11], (1, out_dim), 1),
    }


if __name__ == "__main__":
    B, N, in_dim, hidden_dim, out_dim = 2, 8, 16, 128, 1

    key = jax.random.PRNGKey(0)
    kx, kp = jax.random.split(key)
    x = jax.random.normal(kx, (B, N, in_dim), jnp.float32)
    params = init_params(kp, in_dim, hidden_dim, out_dim)

    out = layer_management_framework(x, params)
    out = jax.block_until_ready(out)

    ref = reference(x, params)
    assert out.shape == (B, out_dim)
    assert jnp.allclose(out, ref, atol=1e-4, rtol=1e-4), (out, ref)

    print("KERNEL_OK")
</pallas_src>

<mosaic_0001>
module attributes {stable_mosaic.version = 11 : i64} {
  func.func @lmf_kernel(%arg0: i32, %arg1: memref<2x8x16xf32, #tpu.memory_space<vmem>>, %arg2: memref<16x128xf32, #tpu.memory_space<vmem>>, %arg3: memref<16x128xf32, #tpu.memory_space<vmem>>, %arg4: memref<1x128xf32, #tpu.memory_space<vmem>>, %arg5: memref<128x128xf32, #tpu.memory_space<vmem>>, %arg6: memref<1x128xf32, #tpu.memory_space<vmem>>, %arg7: memref<128x128xf32, #tpu.memory_space<vmem>>, %arg8: memref<1x128xf32, #tpu.memory_space<vmem>>, %arg9: memref<128x128xf32, #tpu.memory_space<vmem>>, %arg10: memref<1x128xf32, #tpu.memory_space<vmem>>, %arg11: memref<128x128xf32, #tpu.memory_space<vmem>>, %arg12: memref<1x128xf32, #tpu.memory_space<vmem>>, %arg13: memref<2x128xf32, #tpu.memory_space<vmem>>) attributes {dimension_semantics = [#tpu.dimension_semantics<parallel>], iteration_bounds = array<i64: 1>, scalar_prefetch = 0 : i64, scratch_operands = 0 : i64, tpu.core_type = #tpu.core_type<tc>, window_params = [{transform_indices = @transform_0, window_bounds = array<i64: 2, 8, 16>}, {pipeline_mode = #tpu.pipeline_mode<synchronous>, transform_indices = @transform_1, window_bounds = array<i64: 16, 128>}, {pipeline_mode = #tpu.pipeline_mode<synchronous>, transform_indices = @transform_2, window_bounds = array<i64: 16, 128>}, {pipeline_mode = #tpu.pipeline_mode<synchronous>, transform_indices = @transform_3, window_bounds = array<i64: 1, 128>}, {pipeline_mode = #tpu.pipeline_mode<synchronous>, transform_indices = @transform_4, window_bounds = array<i64: 128, 128>}, {pipeline_mode = #tpu.pipeline_mode<synchronous>, transform_indices = @transform_5, window_bounds = array<i64: 1, 128>}, {pipeline_mode = #tpu.pipeline_mode<synchronous>, transform_indices = @transform_6, window_bounds = array<i64: 128, 128>}, {pipeline_mode = #tpu.pipeline_mode<synchronous>, transform_indices = @transform_7, window_bounds = array<i64: 1, 128>}, {pipeline_mode = #tpu.pipeline_mode<synchronous>, transform_indices = @transform_8, window_bounds = array<i64: 128, 128>}, {pipeline_mode = #tpu.pipeline_mode<synchronous>, transform_indices = @transform_9, window_bounds = array<i64: 1, 128>}, {pipeline_mode = #tpu.pipeline_mode<synchronous>, transform_indices = @transform_10, window_bounds = array<i64: 128, 128>}, {pipeline_mode = #tpu.pipeline_mode<synchronous>, transform_indices = @transform_11, window_bounds = array<i64: 1, 128>}, {transform_indices = @transform_12, window_bounds = array<i64: 2, 128>}]} {
    %c0 = arith.constant 0 : index
    %c0_0 = arith.constant 0 : index
    %c0_1 = arith.constant 0 : index
    %0 = vector.load %arg1[%c0, %c0_0, %c0_1] : memref<2x8x16xf32, #tpu.memory_space<vmem>>, vector<2x8x16xf32>
    %1 = vector.extract_strided_slice %0 {offsets = [0, 1, 0], sizes = [2, 7, 16], strides = [1, 1, 1]} : vector<2x8x16xf32> to vector<2x7x16xf32>
    %2 = vector.extract_strided_slice %0 {offsets = [0, 0, 0], sizes = [2, 1, 16], strides = [1, 1, 1]} : vector<2x8x16xf32> to vector<2x1x16xf32>
    %3 = tpu.concatenate %1, %2 in 1 : vector<2x7x16xf32>, vector<2x1x16xf32> -> vector<2x8x16xf32>
    %4 = vector.shape_cast %0 : vector<2x8x16xf32> to vector<16x16xf32>
    %5 = vector.shape_cast %3 : vector<2x8x16xf32> to vector<16x16xf32>
    %c0_2 = arith.constant 0 : index
    %c0_3 = arith.constant 0 : index
    %6 = vector.load %arg2[%c0_2, %c0_3] : memref<16x128xf32, #tpu.memory_space<vmem>>, vector<16x128xf32>
    %cst = arith.constant dense<0.000000e+00> : vector<16x128xf32>
    %7 = tpu.matmul %4, %6, %cst {dimension_numbers = #tpu.dot_dimension_numbers<[1], [0], [0], [1], [0, 0, 1, 1], [], []>} : vector<16x16xf32>, vector<16x128xf32>, vector<16x128xf32> -> vector<16x128xf32>
    %c0_4 = arith.constant 0 : index
    %c0_5 = arith.constant 0 : index
    %8 = vector.load %arg3[%c0_4, %c0_5] : memref<16x128xf32, #tpu.memory_space<vmem>>, vector<16x128xf32>
    %cst_6 = arith.constant dense<0.000000e+00> : vector<16x128xf32>
    %9 = tpu.matmul %5, %8, %cst_6 {dimension_numbers = #tpu.dot_dimension_numbers<[1], [0], [0], [1], [0, 0, 1, 1], [], []>} : vector<16x16xf32>, vector<16x128xf32>, vector<16x128xf32> -> vector<16x128xf32>
    %10 = arith.addf %7, %9 : vector<16x128xf32>
    %c0_7 = arith.constant 0 : index
    %c0_8 = arith.constant 0 : index
    %11 = vector.load %arg4[%c0_7, %c0_8] : memref<1x128xf32, #tpu.memory_space<vmem>>, vector<1x128xf32>
    %12 = vector.broadcast %11 : vector<1x128xf32> to vector<16x128xf32>
    %13 = arith.addf %10, %12 : vector<16x128xf32>
    %cst_9 = arith.constant 0.000000e+00 : f32
    %14 = vector.broadcast %cst_9 : f32 to vector<16x128xf32>
    %15 = arith.maximumf %13, %14 : vector<16x128xf32>
    %c0_10 = arith.constant 0 : index
    %c0_11 = arith.constant 0 : index
    %16 = vector.load %arg5[%c0_10, %c0_11] : memref<128x128xf32, #tpu.memory_space<vmem>>, vector<128x128xf32>
    %cst_12 = arith.constant dense<0.000000e+00> : vector<16x128xf32>
    %17 = tpu.matmul %15, %16, %cst_12 {dimension_numbers = #tpu.dot_dimension_numbers<[1], [0], [0], [1], [0, 0, 1, 1], [], []>} : vector<16x128xf32>, vector<128x128xf32>, vector<16x128xf32> -> vector<16x128xf32>
    %c0_13 = arith.constant 0 : index
    %c0_14 = arith.constant 0 : index
    %18 = vector.load %arg6[%c0_13, %c0_14] : memref<1x128xf32, #tpu.memory_space<vmem>>, vector<1x128xf32>
    %19 = vector.broadcast %18 : vector<1x128xf32> to vector<16x128xf32>
    %20 = arith.addf %17, %19 : vector<16x128xf32>
    %21 = vector.shape_cast %20 : vector<16x128xf32> to vector<2x8x128xf32>
    %cst_15 = arith.constant dense<0.000000e+00> : vector<2x128xf32>
    %22 = vector.multi_reduction <add>, %21, %cst_15 [1] : vector<2x8x128xf32> to vector<2x128xf32>
    %c0_16 = arith.constant 0 : index
    %c0_17 = arith.constant 0 : index
    %23 = vector.load %arg7[%c0_16, %c0_17] : memref<128x128xf32, #tpu.memory_space<vmem>>, vector<128x128xf32>
    %cst_18 = arith.constant dense<0.000000e+00> : vector<2x128xf32>
    %24 = tpu.matmul %22, %23, %cst_18 {dimension_numbers = #tpu.dot_dimension_numbers<[1], [0], [0], [1], [0, 0, 1, 1], [], []>} : vector<2x128xf32>, vector<128x128xf32>, vector<2x128xf32> -> vector<2x128xf32>
    %c0_19 = arith.constant 0 : index
    %c0_20 = arith.constant 0 : index
    %25 = vector.load %arg8[%c0_19, %c0_20] : memref<1x128xf32, #tpu.memory_space<vmem>>, vector<1x128xf32>
    %26 = vector.broadcast %25 : vector<1x128xf32> to vector<2x128xf32>
    %27 = arith.addf %24, %26 : vector<2x128xf32>
    %cst_21 = arith.constant 0.000000e+00 : f32
    %28 = vector.broadcast %cst_21 : f32 to vector<2x128xf32>
    %29 = arith.maximumf %27, %28 : vector<2x128xf32>
    %c0_22 = arith.constant 0 : index
    %c0_23 = arith.constant 0 : index
    %30 = vector.load %arg9[%c0_22, %c0_23] : memref<128x128xf32, #tpu.memory_space<vmem>>, vector<128x128xf32>
    %cst_24 = arith.constant dense<0.000000e+00> : vector<2x128xf32>
    %31 = tpu.matmul %29, %30, %cst_24 {dimension_numbers = #tpu.dot_dimension_numbers<[1], [0], [0], [1], [0, 0, 1, 1], [], []>} : vector<2x128xf32>, vector<128x128xf32>, vector<2x128xf32> -> vector<2x128xf32>
    %c0_25 = arith.constant 0 : index
    %c0_26 = arith.constant 0 : index
    %32 = vector.load %arg10[%c0_25, %c0_26] : memref<1x128xf32, #tpu.memory_space<vmem>>, vector<1x128xf32>
    %33 = vector.broadcast %32 : vector<1x128xf32> to vector<2x128xf32>
    %34 = arith.addf %31, %33 : vector<2x128xf32>
    %cst_27 = arith.constant 0.000000e+00 : f32
    %35 = vector.broadcast %cst_27 : f32 to vector<2x128xf32>
    %36 = arith.maximumf %34, %35 : vector<2x128xf32>
    %c0_28 = arith.constant 0 : index
    %c0_29 = arith.constant 0 : index
    %37 = vector.load %arg11[%c0_28, %c0_29] : memref<128x128xf32, #tpu.memory_space<vmem>>, vector<128x128xf32>
    %cst_30 = arith.constant dense<0.000000e+00> : vector<2x128xf32>
    %38 = tpu.matmul %36, %37, %cst_30 {dimension_numbers = #tpu.dot_dimension_numbers<[1], [0], [0], [1], [0, 0, 1, 1], [], []>} : vector<2x128xf32>, vector<128x128xf32>, vector<2x128xf32> -> vector<2x128xf32>
    %c0_31 = arith.constant 0 : index
    %c0_32 = arith.constant 0 : index
    %39 = vector.load %arg12[%c0_31, %c0_32] : memref<1x128xf32, #tpu.memory_space<vmem>>, vector<1x128xf32>
    %40 = vector.broadcast %39 : vector<1x128xf32> to vector<2x128xf32>
    %41 = arith.addf %38, %40 : vector<2x128xf32>
    %c0_33 = arith.constant 0 : index
    %c0_34 = arith.constant 0 : index
    %42 = vector.load %arg13[%c0_33, %c0_34] : memref<2x128xf32, #tpu.memory_space<vmem>>, vector<2x128xf32>
    tpu.vector_store %arg13[%c0_33, %c0_34], %41 {strides = array<i32>} : memref<2x128xf32, #tpu.memory_space<vmem>>, vector<2x128xf32>,
    return
  }
  func.func @transform_0(%arg0: i32) -> (i32, i32, i32) {
    %c0_i32 = arith.constant 0 : i32
    %c0_i32_0 = arith.constant 0 : i32
    %c0_i32_1 = arith.constant 0 : i32
    return %arg0, %c0_i32, %c0_i32_0 : i32, i32, i32
  }
  func.func @transform_1(%arg0: i32) -> (i32, i32) {
    %c0_i32 = arith.constant 0 : i32
    %c0_i32_0 = arith.constant 0 : i32
    %c0_i32_1 = arith.constant 0 : i32
    return %c0_i32, %c0_i32_0 : i32, i32
  }
  func.func @transform_2(%arg0: i32) -> (i32, i32) {
    %c0_i32 = arith.constant 0 : i32
    %c0_i32_0 = arith.constant 0 : i32
    %c0_i32_1 = arith.constant 0 : i32
    return %c0_i32, %c0_i32_0 : i32, i32
  }
  func.func @transform_3(%arg0: i32) -> (i32, i32) {
    %c0_i32 = arith.constant 0 : i32
    %c0_i32_0 = arith.constant 0 : i32
    %c0_i32_1 = arith.constant 0 : i32
    return %c0_i32, %c0_i32_0 : i32, i32
  }
  func.func @transform_4(%arg0: i32) -> (i32, i32) {
    %c0_i32 = arith.constant 0 : i32
    %c0_i32_0 = arith.constant 0 : i32
    %c0_i32_1 = arith.constant 0 : i32
    return %c0_i32, %c0_i32_0 : i32, i32
  }
  func.func @transform_5(%arg0: i32) -> (i32, i32) {
    %c0_i32 = arith.constant 0 : i32
    %c0_i32_0 = arith.constant 0 : i32
    %c0_i32_1 = arith.constant 0 : i32
    return %c0_i32, %c0_i32_0 : i32, i32
  }
  func.func @transform_6(%arg0: i32) -> (i32, i32) {
    %c0_i32 = arith.constant 0 : i32
    %c0_i32_0 = arith.constant 0 : i32
    %c0_i32_1 = arith.constant 0 : i32
    return %c0_i32, %c0_i32_0 : i32, i32
  }
  func.func @transform_7(%arg0: i32) -> (i32, i32) {
    %c0_i32 = arith.constant 0 : i32
    %c0_i32_0 = arith.constant 0 : i32
    %c0_i32_1 = arith.constant 0 : i32
    return %c0_i32, %c0_i32_0 : i32, i32
  }
  func.func @transform_8(%arg0: i32) -> (i32, i32) {
    %c0_i32 = arith.constant 0 : i32
    %c0_i32_0 = arith.constant 0 : i32
    %c0_i32_1 = arith.constant 0 : i32
    return %c0_i32, %c0_i32_0 : i32, i32
  }
  func.func @transform_9(%arg0: i32) -> (i32, i32) {
    %c0_i32 = arith.constant 0 : i32
    %c0_i32_0 = arith.constant 0 : i32
    %c0_i32_1 = arith.constant 0 : i32
    return %c0_i32, %c0_i32_0 : i32, i32
  }
  func.func @transform_10(%arg0: i32) -> (i32, i32) {
    %c0_i32 = arith.constant 0 : i32
    %c0_i32_0 = arith.constant 0 : i32
    %c0_i32_1 = arith.constant 0 : i32
    return %c0_i32, %c0_i32_0 : i32, i32
  }
  func.func @transform_11(%arg0: i32) -> (i32, i32) {
    %c0_i32 = arith.constant 0 : i32
    %c0_i32_0 = arith.constant 0 : i32
    %c0_i32_1 = arith.constant 0 : i32
    return %c0_i32, %c0_i32_0 : i32, i32
  }
  func.func @transform_12(%arg0: i32) -> (i32, i32) {
    %c0_i32 = arith.constant 0 : i32
    %c0_i32_0 = arith.constant 0 : i32
    return %arg0, %c0_i32 : i32, i32
  }
}

</mosaic_0001>

<bundles_post_ra>
// kernel: tpu_custom_call.1
= control target key start
LH: loop header
LB: loop body
LE: loop exit
PB: predicated region body
PF: predicated region fallthrough
CT: control target
= control target key end

     0   :  { %17 = vsyncpa [#allocation3], 0  ;;  %s794_s0 = inlined_call_operand.hbm [shape: f32[2,8,16], index: 0, kind: input, shape index: {}]   ;;  %s795_s1 = inlined_call_operand.hbm [shape: f32[16,128], index: 1, kind: input, shape index: {}]   ;;  %s796_s2 = inlined_call_operand.hbm [shape: f32[16,128], index: 2, kind: input, shape index: {}]   ;;  %s797_s3 = inlined_call_operand.vmem [shape: f32[1,128], index: 3, kind: input, shape index: {}]   ;;  %s798_s4 = inlined_call_operand.hbm [shape: f32[128,128], index: 4, kind: input, shape index: {}]   ;;  %s799_s5 = inlined_call_operand.vmem [shape: f32[1,128], index: 5, kind: input, shape index: {}]   ;;  %s800_s6 = inlined_call_operand.hbm [shape: f32[128,128], index: 6, kind: input, shape index: {}]   ;;  %s801_s7 = inlined_call_operand.vmem [shape: f32[1,128], index: 7, kind: input, shape index: {}]   ;;  %s802_s8 = inlined_call_operand.hbm [shape: f32[128,128], index: 8, kind: input, shape index: {}]   ;;  %s803_s9 = inlined_call_operand.vmem [shape: f32[1,128], index: 9, kind: input, shape index: {}]   ;;  %s804_s10 = inlined_call_operand.hbm [shape: f32[128,128], index: 10, kind: input, shape index: {}]   ;;  %s805_s11 = inlined_call_operand.vmem [shape: f32[1,128], index: 11, kind: input, shape index: {}]   ;;  %s806_s12 = inlined_call_operand.hbm [shape: f32[2,128], index: 12, kind: output, shape index: {}]  }
   0x1   :  { %18 = vsyncpa [#allocation6], 0 }
   0x2   :  { %19 = vsyncpa [#allocation9], 0 }
   0x3   :  { %20 = vsyncpa [#allocation12], 0 }
   0x4   :  { %21 = vsyncpa [#allocation4], 0  ;;  %s39_s23 = sshll.u32 %s795_s1, 4  ;;  %s655_s24 = smov [#allocation5]   ;;  %s40_s23 = int_to_ptr.hbm [resolvable:$true] %s39_s23 }
   0x5   :  { %s41_s25 = sshll.u32 %s655_s24, 4  ;;  %s67_s28 = sshll.u32 %s798_s4, 4  ;;  %s42_s25 = int_to_ptr.vmem [resolvable:$true] %s41_s25  ;;  %s68_s28 = int_to_ptr.hbm [resolvable:$true] %s67_s28 }
   0x6   :  { %s656_s29 = smov 128   ;;  %s657_s30 = smov 8  }
   0x7   :  { %47 = dma.hbm_to_vmem [thread:$0]  %s40_s23, 256, %s42_s25, [#allocation6], %s656_s29, %s656_s29, %s657_s30  }
   0x8   :  { %s658_s13 = smov [#allocation8]   ;;  %s97_s1 = sshll.u32 %s802_s8, 4  ;;  %s98_s1 = int_to_ptr.hbm [resolvable:$true] %s97_s1 }
   0x9   :  { %s69_s14 = sshll.u32 %s658_s13, 4  ;;  %s26_s18 = sshll.u32 %s794_s0, 4  ;;  %s70_s14 = int_to_ptr.vmem [resolvable:$true] %s69_s14  ;;  %s27_s18 = int_to_ptr.hbm [resolvable:$true] %s26_s18 }
   0xa   :  { %75 = dma.hbm_to_vmem [thread:$0]  %s68_s28, 2048, %s70_s14, [#allocation9], %s656_s29, %s656_s29, %s657_s30  }
   0xb   :  { %s659_s19 = smov [#allocation11]   ;;  %s660_s21 = smov [#allocation2]  }
   0xc   :  { %s99_s20 = sshll.u32 %s659_s19, 4  ;;  %s28_s8 = sshll.u32 %s660_s21, 4  ;;  %s100_s20 = int_to_ptr.vmem [resolvable:$true] %s99_s20  ;;  %s29_s8 = int_to_ptr.vmem [resolvable:$true] %s28_s8 }
   0xd   :  { %105 = dma.hbm_to_vmem [thread:$0]  %s98_s1, 2048, %s100_s20, [#allocation12], %s656_s29, %s656_s29, %s657_s30  }
   0xe   :  { %s52_s24 = sshll.u32 %s796_s2, 4  ;;  %s82_s26 = sshll.u32 %s800_s6, 4  ;;  %s53_s24 = int_to_ptr.hbm [resolvable:$true] %s52_s24  ;;  %s83_s26 = int_to_ptr.hbm [resolvable:$true] %s82_s26 }
   0xf   :  { %34 = dma.hbm_to_vmem [thread:$0]  %s27_s18, 256, %s29_s8, [#allocation3], %s656_s29, %s656_s29, %s657_s30  }
  0x10   :  { %s661_s27 = smov [#allocation7]   ;;  %s662_s13 = smov [#allocation10]  }
  0x11   :  { %s54_s28 = sshll.u32 %s661_s27, 4  ;;  %s84_s2 = sshll.u32 %s662_s13, 4  ;;  %s55_s28 = int_to_ptr.vmem [resolvable:$true] %s54_s28  ;;  %s85_s2 = int_to_ptr.vmem [resolvable:$true] %s84_s2 }
  0x12   :  { %60 = dma.hbm_to_vmem [thread:$0]  %s53_s24, 256, %s55_s28, [#allocation6], %s656_s29, %s656_s29, %s657_s30  }
  0x13   :  { %s112_s16 = sshll.u32 %s804_s10, 4  ;;  %s663_s6 = smov [#allocation13]   ;;  %s113_s16 = int_to_ptr.hbm [resolvable:$true] %s112_s16 }
  0x14   :  { %90 = dma.hbm_to_vmem [thread:$0]  %s83_s26, 2048, %s85_s2, [#allocation9], %s656_s29, %s656_s29, %s657_s30  }
  0x15   :  { %s114_s1 = sshll.u32 %s663_s6, 4  ;;  %s115_s1 = int_to_ptr.vmem [resolvable:$true] %s114_s1 }
  0x16   :  { %120 = dma.hbm_to_vmem [thread:$0]  %s113_s16, 2048, %s115_s1, [#allocation12], %s656_s29, %s656_s29, %s657_s30  }
  0x17   :  { %645 = dma.done.wait [#allocation3], 256  }
  0x18   :  { %646 = vsyncadd [#allocation3], 4294967040 }
  0x19   :  { %647 = dma.done.wait [#allocation6], 512  }
  0x1a   :  { %648 = vsyncadd [#allocation6], 4294966784 }
  0x1b   :  { %649 = dma.done.wait [#allocation9], 4096  }
  0x1c   :  { %650 = vsyncadd [#allocation9], 4294963200 }
  0x1d   :  { %651 = dma.done.wait [#allocation12], 4096  }
  0x1e   :  { %652 = vsyncadd [#allocation12], 4294963200  ;;  %v165_v0 = vld [vmem:[#allocation7 + $0x8] sm:$0xff]  ;;  %v163_v1 = vld [vmem:[#allocation5 + $0x8] sm:$0xff]  ;;  %vm166_vm0 = vcmask 130048   ;;  %vm308_vm1 = vcmask 1041409  }
  0x1f   :  { %v164_v2 = vld [vmem:[#allocation7] sm:$0xff]  ;;  %187 = vmatpush.msra.mxu0 %v165_v0  ;;  %214 = vmatpush.msra.mxu1 %v163_v1  ;;  %v162_v3 = vld [vmem:[#allocation5] sm:$0xff]  ;;  %v246_v6 = vld [vmem:[#allocation8 + $0x78] sm:$0xff]  ;;  %s664_s20 = smov [#allocation14]   ;;  %s421_s23 = sshll.u32 %s806_s12, 4  ;;  %s422_s23 = int_to_ptr.hbm [resolvable:$true] %s421_s23 }
  0x20   :  { %v151_v4 = vld [vmem:[#allocation2] sm:$0xff]  ;;  %v152_v8 = vld [vmem:[#allocation2 + $0x8] sm:$0xff]  ;;  %251 = vmatpush.msra.mxu2 %v246_v6  ;;  %v244_v9 = vld [vmem:[#allocation8 + $0x68] sm:$0xff]  ;;  %s419_s21 = sshll.u32 %s664_s20, 4  ;;  %s420_s21 = int_to_ptr.vmem [resolvable:$true] %s419_s21 }
  0x21   :  { %v155_v5 = vrot.slane %v151_v4, 1  ;;  %188 = vmatpush.msra.mxu0 %v164_v2  ;;  %215 = vmatpush.msra.mxu1 %v162_v3  ;;  %v245_v7 = vld [vmem:[#allocation8 + $0x70] sm:$0xff]  ;;  %v156_v10 = vrot.slane %v152_v8, 1  ;;  %v243_v11 = vld [vmem:[#allocation8 + $0x60] sm:$0xff]  ;;  %v242_v12 = vld [vmem:[#allocation8 + $0x58] sm:$0xff] }
  0x22   :  { %436 = vmatmul.msk.f32.vlgmr.msra.gmra.mxu1 %vm166_vm0, %v151_v4  ;;  %252 = vmatpush.msra.mxu2 %v245_v7  ;;  %v241_v13 = vld [vmem:[#allocation8 + $0x50] sm:$0xff]  ;;  %v240_v14 = vld [vmem:[#allocation8 + $0x48] sm:$0xff]  ;;  %v239_v15 = vld [vmem:[#allocation8 + $0x40] sm:$0xff] }
  0x23   :  { %434 = vmatmul.msk.f32.vlgmr.msra.gmra.mxu0 %vm166_vm0, %v155_v5  ;;  %v238_v16 = vld [vmem:[#allocation8 + $0x38] sm:$0xff]  ;;  %v237_v17 = vld [vmem:[#allocation8 + $0x30] sm:$0xff]  ;;  %v236_v18 = vld [vmem:[#allocation8 + $0x28] sm:$0xff] }
  0x24   :  { %253 = vmatpush.msra.mxu2 %v244_v9  ;;  %v235_v19 = vld [vmem:[#allocation8 + $0x20] sm:$0xff]  ;;  %v234_v20 = vld [vmem:[#allocation8 + $0x18] sm:$0xff]  ;;  %v233_v21 = vld [vmem:[#allocation8 + $0x10] sm:$0xff] }
  0x25   :  { %v232_v22 = vld [vmem:[#allocation8 + $0x8] sm:$0xff]  ;;  %v231_v23 = vld [vmem:[#allocation8] sm:$0xff]  ;;  %v301_v24 = vld [vmem:[#allocation10 + $0x78] sm:$0xff] }
  0x26   :  { %254 = vmatpush.msra.mxu2 %v243_v11  ;;  %v300_v25 = vld [vmem:[#allocation10 + $0x70] sm:$0xff]  ;;  %311 = vmatpush.msra.mxu3 %v301_v24  ;;  %v299_v26 = vld [vmem:[#allocation10 + $0x68] sm:$0xff]  ;;  %v298_v27 = vld [vmem:[#allocation10 + $0x60] sm:$0xff] }
  0x27   :  { %v448_v28 = vld [vmem:[%s797_s3] ss:$0 sm:$0xff]  ;;  %v297_v39 = vld [vmem:[#allocation10 + $0x58] sm:$0xff]  ;;  %v295_v41 = vld [vmem:[#allocation10 + $0x48] sm:$0xff] }
  0x28   :  { %255 = vmatpush.msra.mxu2 %v242_v12  ;;  %312 = vmatpush.msra.mxu3 %v300_v25  ;;  %v296_v40 = vld [vmem:[#allocation10 + $0x50] sm:$0xff]  ;;  %v294_v42 = vld [vmem:[#allocation10 + $0x40] sm:$0xff]  ;;  %v293_v43 = vld [vmem:[#allocation10 + $0x38] sm:$0xff] }
  0x29   :  { %v292_v44 = vld [vmem:[#allocation10 + $0x30] sm:$0xff]  ;;  %v291_v45 = vld [vmem:[#allocation10 + $0x28] sm:$0xff]  ;;  %v290_v46 = vld [vmem:[#allocation10 + $0x20] sm:$0xff] }
  0x2a   :  { %437 = vmatmul.msk.f32.gmra.mxu1 %vm166_vm0, %v152_v8  ;;  %256 = vmatpush.msra.mxu2 %v241_v13  ;;  %v289_v47 = vld [vmem:[#allocation10 + $0x18] sm:$0xff]  ;;  %v288_v48 = vld [vmem:[#allocation10 + $0x10] sm:$0xff]  ;;  %v287_v49 = vld [vmem:[#allocation10 + $0x8] sm:$0xff] }
  0x2b   :  { %435 = vmatmul.msk.f32.gmra.mxu0 %vm166_vm0, %v156_v10  ;;  %313 = vmatpush.msra.mxu3 %v299_v26  ;;  %v286_v50 = vld [vmem:[#allocation10] sm:$0xff]  ;;  %v347_v51 = vld [vmem:[#allocation11 + $0x78] sm:$0xff]  ;;  %v346_v52 = vld [vmem:[#allocation11 + $0x70] sm:$0xff] }
  0x2c   :  { %257 = vmatpush.msra.mxu2 %v240_v14  ;;  %352 = vmatpush.msrb.mxu0 %v347_v51  ;;  %v345_v53 = vld [vmem:[#allocation11 + $0x68] sm:$0xff]  ;;  %v344_v54 = vld [vmem:[#allocation11 + $0x60] sm:$0xff]  ;;  %v449_v55 = vld [vmem:[%s799_s5] ss:$0 sm:$0xff] }
  0x2d   :  { %314 = vmatpush.msra.mxu3 %v298_v27  ;;  %v343_v56 = vld [vmem:[#allocation11 + $0x58] sm:$0xff]  ;;  %v342_v58 = vld [vmem:[#allocation11 + $0x50] sm:$0xff]  ;;  %v341_v60 = vld [vmem:[#allocation11 + $0x48] sm:$0xff] }
  0x2e   :  { %258 = vmatpush.msra.mxu2 %v239_v15  ;;  %353 = vmatpush.msrb.mxu0 %v346_v52  ;;  %v340_v62 = vld [vmem:[#allocation11 + $0x40] sm:$0xff]  ;;  %v339_v0 = vld [vmem:[#allocation11 + $0x38] sm:$0xff]  ;;  %v338_v2 = vld [vmem:[#allocation11 + $0x30] sm:$0xff] }
  0x2f   :  { %315 = vmatpush.msra.mxu3 %v297_v39  ;;  %v337_v5 = vld [vmem:[#allocation11 + $0x28] sm:$0xff]  ;;  %v336_v7 = vld [vmem:[#allocation11 + $0x20] sm:$0xff]  ;;  %v335_v10 = vld [vmem:[#allocation11 + $0x18] sm:$0xff] }
  0x30   :  { %259 = vmatpush.msra.mxu2 %v238_v16  ;;  %354 = vmatpush.msrb.mxu0 %v345_v53  ;;  %v385_v24 = vld [vmem:[#allocation13 + $0x60] sm:$0xff]  ;;  %v384_v25 = vld [vmem:[#allocation13 + $0x58] sm:$0xff]  ;;  %v383_v26 = vld [vmem:[#allocation13 + $0x50] sm:$0xff] }
  0x31   :  { %316 = vmatpush.msra.mxu3 %v296_v40  ;;  %v382_v27 = vld [vmem:[#allocation13 + $0x48] sm:$0xff]  ;;  %v373_v40 = vld [vmem:[#allocation13] sm:$0xff] }
  0x32   :  { %260 = vmatpush.msra.mxu2 %v237_v17  ;;  %355 = vmatpush.msrb.mxu0 %v344_v54  ;;  %v374_v39 = vld [vmem:[#allocation13 + $0x8] sm:$0xff] }
  0x33   :  { %317 = vmatpush.msra.mxu3 %v295_v41  ;;  %v451_v41 = vld [vmem:[%s803_s9] ss:$0 sm:$0xff] }
  0x34   :  { %261 = vmatpush.msra.mxu2 %v236_v18  ;;  %356 = vmatpush.msrb.mxu0 %v343_v56  ;;  %v334_v18 = vld [vmem:[#allocation11 + $0x10] sm:$0xff] }
  0x35   :  { %318 = vmatpush.msra.mxu3 %v294_v42 }
  0x36   :  { %262 = vmatpush.msra.mxu2 %v235_v19  ;;  %357 = vmatpush.msrb.mxu0 %v342_v58  ;;  %v333_v19 = vld [vmem:[#allocation11 + $0x8] sm:$0xff] }
  0x37   :  { %319 = vmatpush.msra.mxu3 %v293_v43 }
  0x38   :  { %263 = vmatpush.msra.mxu2 %v234_v20  ;;  %358 = vmatpush.msrb.mxu0 %v341_v60  ;;  %v332_v20 = vld [vmem:[#allocation11] sm:$0xff] }
  0x39   :  { %320 = vmatpush.msra.mxu3 %v292_v44 }
  0x3a   :  { %264 = vmatpush.msra.mxu2 %v233_v21  ;;  %359 = vmatpush.msrb.mxu0 %v340_v62  ;;  %v388_v21 = vld [vmem:[#allocation13 + $0x78] sm:$0xff] }
  0x3b   :  { %321 = vmatpush.msra.mxu3 %v291_v45  ;;  %393 = vmatpush.msrb.mxu1 %v388_v21  ;;  %v452_v45 = vld [vmem:[%s805_s11] ss:$0 sm:$0xff] }
  0x3c   :  { %265 = vmatpush.msra.mxu2 %v232_v22  ;;  %360 = vmatpush.msrb.mxu0 %v339_v0  ;;  %v387_v22 = vld [vmem:[#allocation13 + $0x70] sm:$0xff] }
  0x3d   :  { %322 = vmatpush.msra.mxu3 %v290_v46  ;;  %394 = vmatpush.msrb.mxu1 %v387_v22 }
  0x3e   :  { %266 = vmatpush.msra.mxu2 %v231_v23  ;;  %361 = vmatpush.msrb.mxu0 %v338_v2  ;;  %v386_v23 = vld [vmem:[#allocation13 + $0x68] sm:$0xff] }
  0x3f   :  { %323 = vmatpush.msra.mxu3 %v289_v47  ;;  %395 = vmatpush.msrb.mxu1 %v386_v23 }
  0x40   :  { %362 = vmatpush.msrb.mxu0 %v337_v5 }
  0x41   :  { %324 = vmatpush.msra.mxu3 %v288_v48  ;;  %396 = vmatpush.msrb.mxu1 %v385_v24 }
  0x42   :  { %363 = vmatpush.msrb.mxu0 %v336_v7 }
  0x43   :  { %325 = vmatpush.msra.mxu3 %v287_v49  ;;  %397 = vmatpush.msrb.mxu1 %v384_v25 }
  0x44   :  { %364 = vmatpush.msrb.mxu0 %v335_v10 }
  0x45   :  { %326 = vmatpush.msra.mxu3 %v286_v50  ;;  %398 = vmatpush.msrb.mxu1 %v383_v26 }
  0x46   :  { %365 = vmatpush.msrb.mxu0 %v334_v18 }
  0x47   :  { %399 = vmatpush.msrb.mxu1 %v382_v27 }
  0x48   :  { %366 = vmatpush.msrb.mxu0 %v333_v19 }
  0x4a   :  { %367 = vmatpush.msrb.mxu0 %v332_v20 }
  0x9f   :  { %v217_v30 = vpop.f32.mrf.mxu1 }
  0xa0   :  { %v190_v29 = vpop.f32.mrf.mxu0 }
  0xa1   :  { %v218_v31 = vadd.f32 %v217_v30, %v190_v29  ;;  %v380_v29 = vld [vmem:[#allocation13 + $0x38] sm:$0xff]  ;;  %v379_v30 = vld [vmem:[#allocation13 + $0x30] sm:$0xff] }
  0xa3   :  { %v227_v32 = vadd.f32 %v448_v28, %v218_v31  ;;  %v378_v31 = vld [vmem:[#allocation13 + $0x28] sm:$0xff] }
  0xa5   :  { %v229_v33 = vmax.f32 %v227_v32, 0.0  ;;  %v377_v32 = vld [vmem:[#allocation13 + $0x20] sm:$0xff] }
  0xa7   :  { %267 = vmatmul.f32.vlgmr.msra.gmra.mxu2 %v229_v33  ;;  %v220_v35 = vpop.f32.mrf.mxu1  ;;  %v376_v33 = vld [vmem:[#allocation13 + $0x18] sm:$0xff] }
  0xa8   :  { %v193_v34 = vpop.f32.mrf.mxu0 }
  0xa9   :  { %v221_v36 = vadd.f32 %v220_v35, %v193_v34  ;;  %v450_v34 = vld [vmem:[%s801_s7] ss:$0 sm:$0xff] }
  0xab   :  { %v228_v37 = vadd.f32 %v448_v28, %v221_v36  ;;  %v381_v28 = vld [vmem:[#allocation13 + $0x40] sm:$0xff] }
  0xac   :  { %400 = vmatpush.msrb.mxu1 %v381_v28 }
  0xad   :  { %v230_v38 = vmax.f32 %v228_v37, 0.0 }
  0xae   :  { %401 = vmatpush.msrb.mxu1 %v380_v29 }
  0xaf   :  { %270 = vmatmul.f32.gmra.mxu2 %v230_v38  ;;  %v375_v38 = vld [vmem:[#allocation13 + $0x10] sm:$0xff] }
  0xb0   :  { %402 = vmatpush.msrb.mxu1 %v379_v30 }
  0xb2   :  { %403 = vmatpush.msrb.mxu1 %v378_v31 }
  0xb4   :  { %404 = vmatpush.msrb.mxu1 %v377_v32 }
  0xb6   :  { %405 = vmatpush.msrb.mxu1 %v376_v33 }
  0xb8   :  { %406 = vmatpush.msrb.mxu1 %v375_v38 }
  0xba   :  { %407 = vmatpush.msrb.mxu1 %v374_v39 }
  0xbc   :  { %408 = vmatpush.msrb.mxu1 %v373_v40 }
 0x12a   :  { %v268_v57 = vpop.f32.mrf.mxu2 }
 0x12b   :  { %v269_v59 = vadd.f32 %v449_v55, %v268_v57 }
 0x12d   :  { %v274_v61 = vrot.slane %v269_v59, 4 }
 0x12f   :  { %v275_v63 = vadd.f32 %v274_v61, %v269_v59 }
 0x131   :  { %v276_v3 = vrot.slane %v275_v63, 2 }
 0x132   :  { %v271_v1 = vpop.f32.mrf.mxu2 }
 0x133   :  { %v272_v4 = vadd.f32 %v449_v55, %v271_v1  ;;  %v277_v8 = vadd.f32 %v276_v3, %v275_v63 }
 0x135   :  { %v280_v6 = vrot.slane %v272_v4, 4  ;;  %v278_v12 = vrot.slane %v277_v8, 1 }
 0x137   :  { %v281_v9 = vadd.f32 %v280_v6, %v272_v4  ;;  %v279_v15 = vadd.f32 %v278_v12, %v277_v8 }
 0x139   :  { %v282_v11 = vrot.slane %v281_v9, 2 }
 0x13b   :  { %v283_v13 = vadd.f32 %v282_v11, %v281_v9 }
 0x13d   :  { %v284_v14 = vrot.slane %v283_v13, 1 }
 0x13f   :  { %v285_v16 = vadd.f32 %v284_v14, %v283_v13 }
 0x141   :  { %v309_v17 = vsel %vm308_vm1, %v285_v16, %v279_v15 }
 0x142   :  { %327 = vmatmul.f32.vlgmr.msra.gmra.mxu3 %v309_v17 }
 0x1c5   :  { %v328_v35 = vpop.f32.mrf.mxu3 }
 0x1c6   :  { %v329_v36 = vadd.f32 %v450_v34, %v328_v35 }
 0x1c8   :  { %v331_v37 = vmax.f32 %v329_v36, 0.0 }
 0x1ca   :  { %368 = vmatmul.f32.vlgmr.msrb.gmra.mxu0 %v331_v37 }
 0x247   :  { %v369_v42 = vpop.f32.mrf.mxu0 }
 0x248   :  { %v370_v43 = vadd.f32 %v451_v41, %v369_v42 }
 0x24a   :  { %v372_v44 = vmax.f32 %v370_v43, 0.0 }
 0x24c   :  { %409 = vmatmul.f32.vlgmr.msrb.gmra.mxu1 %v372_v44 }
 0x2c9   :  { %v410_v46 = vpop.f32.mrf.mxu1 }
 0x2ca   :  { %v411_v47 = vadd.f32 %v452_v45, %v410_v46 }
 0x2cc   :  { %413 = vst [vmem:[#allocation14] sm:$0x3] %v411_v47 }
 0x2cd   :  { %424 = dma.vmem_to_hbm [thread:$0]  %s420_s21, 32, %s422_s23, [#allocation4]  }
 0x2ce   :  { %653 = dma.done.wait [#allocation4], 32  }
 0x2cf   :  { %654 = vsyncadd [#allocation4], 4294967264 }
 0x2d0   :  { %429 = vsyncpa [#allocation3], 1 }
 0x2d1   :  { %430 = vsyncpa [#allocation6], 1 }
 0x2d2   :  { %431 = vsyncpa [#allocation9], 1 }
 0x2d3   :  { %432 = vsyncpa [#allocation12], 1 }
 0x2d4   :  { %433 = vsyncpa [#allocation4], 1 }

</bundles_post_ra>
